<compile_context>
chip_gen: v7x
topology: tpu7x:2x2x1
jax: 0.10.0
libtpu: 0.0.40
codegen_flags: <defaults>
</compile_context>

<pallas_src>
import math

import jax
import jax.numpy as jnp
from jax.experimental import pallas as pl
from jax.experimental.pallas import tpu as pltpu

IN_DIM = 8
H1 = 128
H2 = 64
H3 = 128
OUT_DIM = 4
OUT_PAD = 8         # pad logits 4 -> 8 sublanes (zero weight rows, -1e30 bias)
NEG = -1e30         # padded-logit bias -> exp underflows to exactly 0
TB_MAX = 2048       # batch lanes per grid step (VMEM use per step ~ a few MiB)


def _round_up(n, m):
    return ((n + m - 1) // m) * m


def _policy_kernel(x_ref,
                   w1_ref, b1_ref,
                   w2_ref, b2_ref,
                   w3_ref, b3_ref,
                   w4_ref, b4_ref,
                   o_ref):
    """Fused 4-layer MLP + softmax, feature-major: activations are (feat, tb).

    Weights are bf16 in PyTorch (out,in) layout; MXU accumulates f32; bias adds,
    ReLU and softmax run in f32.  Softmax reduces over the 8 sublanes (4 real
    logits + 4 padded ones whose exp is exactly 0).
    """
    x = x_ref[...].astype(jnp.bfloat16)                      # (8, tb)

    # Linear(8,128) + ReLU:  (128,8) @ (8,tb) -> (128,tb)
    h = jnp.dot(w1_ref[...], x, preferred_element_type=jnp.float32) + b1_ref[...]
    h = jnp.maximum(h, 0.0)

    # Linear(128,64) + ReLU: (64,128) @ (128,tb) -> (64,tb)
    h = jnp.dot(w2_ref[...], h.astype(jnp.bfloat16),
                preferred_element_type=jnp.float32) + b2_ref[...]
    h = jnp.maximum(h, 0.0)

    # Linear(64,128) + ReLU: (128,64) @ (64,tb) -> (128,tb)
    h = jnp.dot(w3_ref[...], h.astype(jnp.bfloat16),
                preferred_element_type=jnp.float32) + b3_ref[...]
    h = jnp.maximum(h, 0.0)

    # Linear(128,4) padded to 8 output rows: (8,128) @ (128,tb) -> (8,tb)
    logits = jnp.dot(w4_ref[...], h.astype(jnp.bfloat16),
                     preferred_element_type=jnp.float32) + b4_ref[...]

    # Numerically stable softmax over the 8 sublanes (== softmax over the 4
    # real logits; padded rows contribute exp(-1e30 - m) == 0).  Exact divide
    # (not approx reciprocal) so probabilities are safe for log-prob/entropy.
    m = jnp.max(logits, axis=0, keepdims=True)               # (1, tb)
    e = jnp.exp(logits - m)                                   # (8, tb)
    denom = jnp.sum(e, axis=0, keepdims=True)                 # (1, tb)
    o_ref[...] = (e / denom).astype(o_ref.dtype)              # lane-dense store


def _resident_spec(shape):
    """Full-extent block, constant index map -> stays in VMEM across the grid."""
    return pl.BlockSpec(shape, lambda i: tuple(0 for _ in shape))


def _default_min_steps():
    """>=2 grid steps on v7x so both TensorCores get work; 1 elsewhere."""
    try:
        kind = jax.devices()[0].device_kind.lower()
        if "v7" in kind:
            return 2
    except Exception:
        pass
    return 1


def policy_net_forward(x, params, *, tb=TB_MAX, min_steps=None):
    """x: (B, 8) float32 -> (B, 4) float32 softmax probabilities."""
    w1, b1, w2, b2, w3, b3, w4p, b4p = params   # already padded / layout-prepped
    B = x.shape[0]

    if min_steps is None:
        min_steps = _default_min_steps()

    # Batch lives on the lane axis: round up to 128 lanes, then tile.
    lanes = _round_up(B, 128)
    tb_eff = min(tb, _round_up(pl.cdiv(lanes, min_steps), 128))
    grid_b = pl.cdiv(lanes, tb_eff)
    b_pad = grid_b * tb_eff

    if b_pad != B:
        x = jnp.pad(x, ((0, b_pad - B), (0, 0)))
    x_fm = x.T                                               # (8, b_pad), tiny op

    out = pl.pallas_call(
        _policy_kernel,
        out_shape=jax.ShapeDtypeStruct((OUT_PAD, b_pad), jnp.float32),
        grid=(grid_b,),
        in_specs=[
            pl.BlockSpec((IN_DIM, tb_eff), lambda i: (0, i)),   # x: tiled on lanes
            _resident_spec(w1.shape), _resident_spec(b1.shape),
            _resident_spec(w2.shape), _resident_spec(b2.shape),
            _resident_spec(w3.shape), _resident_spec(b3.shape),
            _resident_spec(w4p.shape), _resident_spec(b4p.shape),
        ],
        out_specs=pl.BlockSpec((OUT_PAD, tb_eff), lambda i: (0, i)),
        compiler_params=pltpu.CompilerParams(
            dimension_semantics=("parallel",),
        ),
    )(x_fm, w1, b1, w2, b2, w3, b3, w4p, b4p)

    # (8, b_pad) -> (B, 4); operates on a slab 1/16 the size of the old layout.
    return out[:OUT_DIM, :B].T


def init_params(key):
    """torch.nn.Linear-style init: U(-1/sqrt(fan_in), 1/sqrt(fan_in)).

    Weights are stored in PyTorch (out_dim, in_dim) layout in bf16 (exactly the
    feature-major layout the kernel consumes, no per-call transpose); biases are
    f32 columns (out_dim, 1).  The last layer is pre-padded 4 -> 8 output rows
    (zero weights, -1e30 bias) once, here, not per forward call.
    """
    dims = [(IN_DIM, H1), (H1, H2), (H2, H3), (H3, OUT_DIM)]
    params = []
    for fan_in, fan_out in dims:
        key, kw, kb = jax.random.split(key, 3)
        bound = 1.0 / math.sqrt(fan_in)
        w = jax.random.uniform(kw, (fan_out, fan_in), jnp.float32,
                               -bound, bound).astype(jnp.bfloat16)
        b = jax.random.uniform(kb, (fan_out, 1), jnp.float32, -bound, bound)
        params += [w, b]

    w1, b1, w2, b2, w3, b3, w4, b4 = params
    w4p = jnp.zeros((OUT_PAD, H3), jnp.bfloat16).at[:OUT_DIM].set(w4)
    b4p = jnp.full((OUT_PAD, 1), NEG, jnp.float32).at[:OUT_DIM].set(b4)
    return (w1, b1, w2, b2, w3, b3, w4p, b4p)


def _reference_forward(x, params):
    """Plain-JAX reference with identical bf16-weight / f32-accumulate math."""
    w1, b1, w2, b2, w3, b3, w4p, b4p = params

    def lin(h, w, b):   # w: (out,in) bf16, b: (out,1) f32
        return jnp.dot(h.astype(jnp.bfloat16), w.T,
                       preferred_element_type=jnp.float32) + b.T

    h = jnp.maximum(lin(x, w1, b1), 0.0)
    h = jnp.maximum(lin(h, w2, b2), 0.0)
    h = jnp.maximum(lin(h, w3, b3), 0.0)
    logits = lin(h, w4p[:OUT_DIM], b4p[:OUT_DIM])
    return jax.nn.softmax(logits, axis=-1)


if __name__ == "__main__":
    key = jax.random.PRNGKey(0)
    key, kx = jax.random.split(key)

    B = 16  # small batch of 8-dim states (LunarLander-style observations)
    x = jax.random.normal(kx, (B, IN_DIM), dtype=jnp.float32)

    params = init_params(key)

    fwd = jax.jit(lambda xx: policy_net_forward(xx, params))
    out = jax.block_until_ready(fwd(x))

    ref = _reference_forward(x, params)
    assert out.shape == (B, OUT_DIM)
    # Exact-divide softmax: rows are true probability distributions.
    assert jnp.allclose(jnp.sum(out, axis=-1), 1.0, atol=1e-4)
    assert jnp.allclose(out, ref, atol=2e-3, rtol=2e-2)

    print("KERNEL_OK")
</pallas_src>

<mosaic_0001>
module attributes {stable_mosaic.version = 11 : i64} {
  func.func @_policy_kernel(%arg0: i32, %arg1: memref<8x128xf32, #tpu.memory_space<vmem>>, %arg2: memref<128x8xbf16, #tpu.memory_space<vmem>>, %arg3: memref<128x1xf32, #tpu.memory_space<vmem>>, %arg4: memref<64x128xbf16, #tpu.memory_space<vmem>>, %arg5: memref<64x1xf32, #tpu.memory_space<vmem>>, %arg6: memref<128x64xbf16, #tpu.memory_space<vmem>>, %arg7: memref<128x1xf32, #tpu.memory_space<vmem>>, %arg8: memref<8x128xbf16, #tpu.memory_space<vmem>>, %arg9: memref<8x1xf32, #tpu.memory_space<vmem>>, %arg10: memref<8x128xf32, #tpu.memory_space<vmem>>) attributes {dimension_semantics = [#tpu.dimension_semantics<parallel>], iteration_bounds = array<i64: 1>, scalar_prefetch = 0 : i64, scratch_operands = 0 : i64, tpu.core_type = #tpu.core_type<tc>, window_params = [{transform_indices = @transform_0, window_bounds = array<i64: 8, 128>}, {pipeline_mode = #tpu.pipeline_mode<synchronous>, transform_indices = @transform_1, window_bounds = array<i64: 128, 8>}, {pipeline_mode = #tpu.pipeline_mode<synchronous>, transform_indices = @transform_2, window_bounds = array<i64: 128, 1>}, {pipeline_mode = #tpu.pipeline_mode<synchronous>, transform_indices = @transform_3, window_bounds = array<i64: 64, 128>}, {pipeline_mode = #tpu.pipeline_mode<synchronous>, transform_indices = @transform_4, window_bounds = array<i64: 64, 1>}, {pipeline_mode = #tpu.pipeline_mode<synchronous>, transform_indices = @transform_5, window_bounds = array<i64: 128, 64>}, {pipeline_mode = #tpu.pipeline_mode<synchronous>, transform_indices = @transform_6, window_bounds = array<i64: 128, 1>}, {pipeline_mode = #tpu.pipeline_mode<synchronous>, transform_indices = @transform_7, window_bounds = array<i64: 8, 128>}, {pipeline_mode = #tpu.pipeline_mode<synchronous>, transform_indices = @transform_8, window_bounds = array<i64: 8, 1>}, {transform_indices = @transform_9, window_bounds = array<i64: 8, 128>}]} {
    %c0 = arith.constant 0 : index
    %c0_0 = arith.constant 0 : index
    %0 = vector.load %arg1[%c0, %c0_0] : memref<8x128xf32, #tpu.memory_space<vmem>>, vector<8x128xf32>
    %1 = arith.truncf %0 : vector<8x128xf32> to vector<8x128xbf16>
    %c0_1 = arith.constant 0 : index
    %c0_2 = arith.constant 0 : index
    %2 = vector.load %arg2[%c0_1, %c0_2] : memref<128x8xbf16, #tpu.memory_space<vmem>>, vector<128x8xbf16>
    %cst = arith.constant dense<0.000000e+00> : vector<128x128xf32>
    %3 = tpu.matmul %2, %1, %cst {dimension_numbers = #tpu.dot_dimension_numbers<[1], [0], [0], [1], [0, 0, 1, 1], [], []>} : vector<128x8xbf16>, vector<8x128xbf16>, vector<128x128xf32> -> vector<128x128xf32>
    %c0_3 = arith.constant 0 : index
    %c0_4 = arith.constant 0 : index
    %4 = vector.load %arg3[%c0_3, %c0_4] : memref<128x1xf32, #tpu.memory_space<vmem>>, vector<128x1xf32>
    %5 = vector.broadcast %4 : vector<128x1xf32> to vector<128x128xf32>
    %6 = arith.addf %3, %5 : vector<128x128xf32>
    %cst_5 = arith.constant 0.000000e+00 : f32
    %7 = vector.broadcast %cst_5 : f32 to vector<128x128xf32>
    %8 = arith.maximumf %6, %7 : vector<128x128xf32>
    %c0_6 = arith.constant 0 : index
    %c0_7 = arith.constant 0 : index
    %9 = vector.load %arg4[%c0_6, %c0_7] : memref<64x128xbf16, #tpu.memory_space<vmem>>, vector<64x128xbf16>
    %10 = arith.truncf %8 : vector<128x128xf32> to vector<128x128xbf16>
    %cst_8 = arith.constant dense<0.000000e+00> : vector<64x128xf32>
    %11 = tpu.matmul %9, %10, %cst_8 {dimension_numbers = #tpu.dot_dimension_numbers<[1], [0], [0], [1], [0, 0, 1, 1], [], []>} : vector<64x128xbf16>, vector<128x128xbf16>, vector<64x128xf32> -> vector<64x128xf32>
    %c0_9 = arith.constant 0 : index
    %c0_10 = arith.constant 0 : index
    %12 = vector.load %arg5[%c0_9, %c0_10] : memref<64x1xf32, #tpu.memory_space<vmem>>, vector<64x1xf32>
    %13 = vector.broadcast %12 : vector<64x1xf32> to vector<64x128xf32>
    %14 = arith.addf %11, %13 : vector<64x128xf32>
    %cst_11 = arith.constant 0.000000e+00 : f32
    %15 = vector.broadcast %cst_11 : f32 to vector<64x128xf32>
    %16 = arith.maximumf %14, %15 : vector<64x128xf32>
    %c0_12 = arith.constant 0 : index
    %c0_13 = arith.constant 0 : index
    %17 = vector.load %arg6[%c0_12, %c0_13] : memref<128x64xbf16, #tpu.memory_space<vmem>>, vector<128x64xbf16>
    %18 = arith.truncf %16 : vector<64x128xf32> to vector<64x128xbf16>
    %cst_14 = arith.constant dense<0.000000e+00> : vector<128x128xf32>
    %19 = tpu.matmul %17, %18, %cst_14 {dimension_numbers = #tpu.dot_dimension_numbers<[1], [0], [0], [1], [0, 0, 1, 1], [], []>} : vector<128x64xbf16>, vector<64x128xbf16>, vector<128x128xf32> -> vector<128x128xf32>
    %c0_15 = arith.constant 0 : index
    %c0_16 = arith.constant 0 : index
    %20 = vector.load %arg7[%c0_15, %c0_16] : memref<128x1xf32, #tpu.memory_space<vmem>>, vector<128x1xf32>
    %21 = vector.broadcast %20 : vector<128x1xf32> to vector<128x128xf32>
    %22 = arith.addf %19, %21 : vector<128x128xf32>
    %cst_17 = arith.constant 0.000000e+00 : f32
    %23 = vector.broadcast %cst_17 : f32 to vector<128x128xf32>
    %24 = arith.maximumf %22, %23 : vector<128x128xf32>
    %c0_18 = arith.constant 0 : index
    %c0_19 = arith.constant 0 : index
    %25 = vector.load %arg8[%c0_18, %c0_19] : memref<8x128xbf16, #tpu.memory_space<vmem>>, vector<8x128xbf16>
    %26 = arith.truncf %24 : vector<128x128xf32> to vector<128x128xbf16>
    %cst_20 = arith.constant dense<0.000000e+00> : vector<8x128xf32>
    %27 = tpu.matmul %25, %26, %cst_20 {dimension_numbers = #tpu.dot_dimension_numbers<[1], [0], [0], [1], [0, 0, 1, 1], [], []>} : vector<8x128xbf16>, vector<128x128xbf16>, vector<8x128xf32> -> vector<8x128xf32>
    %c0_21 = arith.constant 0 : index
    %c0_22 = arith.constant 0 : index
    %28 = vector.load %arg9[%c0_21, %c0_22] : memref<8x1xf32, #tpu.memory_space<vmem>>, vector<8x1xf32>
    %29 = vector.broadcast %28 : vector<8x1xf32> to vector<8x128xf32>
    %30 = arith.addf %27, %29 : vector<8x128xf32>
    %cst_23 = arith.constant dense<0xFF800000> : vector<128xf32>
    %31 = vector.multi_reduction <maximumf>, %30, %cst_23 [0] : vector<8x128xf32> to vector<128xf32>
    %32 = vector.shape_cast %31 : vector<128xf32> to vector<1x128xf32>
    %33 = vector.broadcast %32 : vector<1x128xf32> to vector<8x128xf32>
    %34 = arith.subf %30, %33 : vector<8x128xf32>
    %35 = math.exp %34 : vector<8x128xf32>
    %cst_24 = arith.constant dense<0.000000e+00> : vector<128xf32>
    %36 = vector.multi_reduction <add>, %35, %cst_24 [0] : vector<8x128xf32> to vector<128xf32>
    %37 = vector.shape_cast %36 : vector<128xf32> to vector<1x128xf32>
    %38 = vector.broadcast %37 : vector<1x128xf32> to vector<8x128xf32>
    %39 = arith.divf %35, %38 : vector<8x128xf32>
    %c0_25 = arith.constant 0 : index
    %c0_26 = arith.constant 0 : index
    %40 = vector.load %arg10[%c0_25, %c0_26] : memref<8x128xf32, #tpu.memory_space<vmem>>, vector<8x128xf32>
    tpu.vector_store %arg10[%c0_25, %c0_26], %39 {strides = array<i32>} : memref<8x128xf32, #tpu.memory_space<vmem>>, vector<8x128xf32>,
    return
  }
  func.func @transform_0(%arg0: i32) -> (i32, i32) {
    %c0_i32 = arith.constant 0 : i32
    %c0_i32_0 = arith.constant 0 : i32
    return %c0_i32, %arg0 : i32, i32
  }
  func.func @transform_1(%arg0: i32) -> (i32, i32) {
    %c0_i32 = arith.constant 0 : i32
    %c0_i32_0 = arith.constant 0 : i32
    %c0_i32_1 = arith.constant 0 : i32
    return %c0_i32, %c0_i32_0 : i32, i32
  }
  func.func @transform_2(%arg0: i32) -> (i32, i32) {
    %c0_i32 = arith.constant 0 : i32
    %c0_i32_0 = arith.constant 0 : i32
    %c0_i32_1 = arith.constant 0 : i32
    return %c0_i32, %c0_i32_0 : i32, i32
  }
  func.func @transform_3(%arg0: i32) -> (i32, i32) {
    %c0_i32 = arith.constant 0 : i32
    %c0_i32_0 = arith.constant 0 : i32
    %c0_i32_1 = arith.constant 0 : i32
    return %c0_i32, %c0_i32_0 : i32, i32
  }
  func.func @transform_4(%arg0: i32) -> (i32, i32) {
    %c0_i32 = arith.constant 0 : i32
    %c0_i32_0 = arith.constant 0 : i32
    %c0_i32_1 = arith.constant 0 : i32
    return %c0_i32, %c0_i32_0 : i32, i32
  }
  func.func @transform_5(%arg0: i32) -> (i32, i32) {
    %c0_i32 = arith.constant 0 : i32
    %c0_i32_0 = arith.constant 0 : i32
    %c0_i32_1 = arith.constant 0 : i32
    return %c0_i32, %c0_i32_0 : i32, i32
  }
  func.func @transform_6(%arg0: i32) -> (i32, i32) {
    %c0_i32 = arith.constant 0 : i32
    %c0_i32_0 = arith.constant 0 : i32
    %c0_i32_1 = arith.constant 0 : i32
    return %c0_i32, %c0_i32_0 : i32, i32
  }
  func.func @transform_7(%arg0: i32) -> (i32, i32) {
    %c0_i32 = arith.constant 0 : i32
    %c0_i32_0 = arith.constant 0 : i32
    %c0_i32_1 = arith.constant 0 : i32
    return %c0_i32, %c0_i32_0 : i32, i32
  }
  func.func @transform_8(%arg0: i32) -> (i32, i32) {
    %c0_i32 = arith.constant 0 : i32
    %c0_i32_0 = arith.constant 0 : i32
    %c0_i32_1 = arith.constant 0 : i32
    return %c0_i32, %c0_i32_0 : i32, i32
  }
  func.func @transform_9(%arg0: i32) -> (i32, i32) {
    %c0_i32 = arith.constant 0 : i32
    %c0_i32_0 = arith.constant 0 : i32
    return %c0_i32, %arg0 : i32, i32
  }
}

</mosaic_0001>

<bundles_post_ra>
// kernel: _lambda_.1
= control target key start
LH: loop header
LB: loop body
LE: loop exit
PB: predicated region body
PF: predicated region fallthrough
CT: control target
= control target key end

     0   :  { %14 = vsyncpa [#allocation3], 0  ;;  %s1431_s0 = inlined_call_operand.vmem [shape: f32[8,128], index: 0, kind: input, shape index: {}]   ;;  %s1432_s1 = inlined_call_operand.hbm [shape: bf16[128,8], index: 1, kind: input, shape index: {}]   ;;  %s1433_s2 = inlined_call_operand.hbm [shape: f32[128,1], index: 2, kind: input, shape index: {}]   ;;  %s1434_s3 = inlined_call_operand.vmem [shape: bf16[64,128], index: 3, kind: input, shape index: {}]   ;;  %s1435_s4 = inlined_call_operand.hbm [shape: f32[64,1], index: 4, kind: input, shape index: {}]   ;;  %s1436_s5 = inlined_call_operand.hbm [shape: bf16[128,64], index: 5, kind: input, shape index: {}]   ;;  %s1437_s6 = inlined_call_operand.hbm [shape: f32[128,1], index: 6, kind: input, shape index: {}]   ;;  %s1438_s7 = inlined_call_operand.vmem [shape: bf16[8,128], index: 7, kind: input, shape index: {}]   ;;  %s1439_s8 = inlined_call_operand.vmem [shape: f32[8,1], index: 8, kind: input, shape index: {}]   ;;  %s1440_s9 = inlined_call_operand.vmem [shape: f32[8,128], index: 9, kind: output, shape index: {}]  }
   0x1   :  { %15 = vsyncpa [#allocation5], 0 }
   0x2   :  { %16 = vsyncpa [#allocation8], 0  ;;  %s1251_s30 = smov [#allocation4]   ;;  %s1135_s13 = scalar_lea.hbm %s1433_s2, 2048 }
   0x3   :  { %s36_s10 = sshll.u32 %s1251_s30, 4  ;;  %p1136_p0 = scmp.ne.s32.totalorder %s1433_s2, %s1135_s13  ;;  %s37_s10 = int_to_ptr.vmem [resolvable:$true] %s36_s10 }
   0x4   :  { %p1139_p1 = scmp.lt.u32.totalorder %s1135_s13, %s1433_s2 }
   0x6   :  { %p1141_p2 = pnand %p1139_p1, %p1136_p0 }
   0x8   :  { %1144 = shalt.err (!%p1141_p2)
}
   0x9   :  { %s1145_s18 = scalar_lea.vmem %s37_s10, 2048  ;;  %p1150_p4 = scmp.lt.s32.totalorder %s37_s10, %s37_s10 }
   0xa   :  { %p1146_p3 = scmp.ne.s32.totalorder %s37_s10, %s1145_s18  ;;  %p1151_p5 = scmp.lt.s32.totalorder %s1145_s18, %s1145_s18 }
   0xc   :  { %p1152_p6 = por %p1151_p5, %p1150_p4 }
   0xe   :  { %p1153_p7 = pnand %p1152_p6, %p1146_p3 }
  0x10   :  { %1156 = shalt.err (!%p1153_p7)
}
  0x11   :  { %s1252_s19 = smov 128   ;;  %s1253_s20 = smov 8  }
  0x12   :  { %42 = dma.hbm_to_vmem [thread:$0]  %s1433_s2, 2048, %s37_s10, [#allocation5], %s1252_s19, %s1252_s19, %s1253_s20  }
  0x13   :  { %s1254_s23 = smov [#allocation7]   ;;  %s1255_s25 = smov [#allocation2]  }
  0x14   :  { %s62_s24 = sshll.u32 %s1254_s23, 4  ;;  %s24_s26 = sshll.u32 %s1255_s25, 4  ;;  %s63_s24 = int_to_ptr.vmem [resolvable:$true] %s62_s24  ;;  %s25_s26 = int_to_ptr.vmem [resolvable:$true] %s24_s26 }
  0x15   :  { %s1157_s29 = scalar_lea.hbm %s1436_s5, 1024 }
  0x16   :  { %p1158_p8 = scmp.ne.s32.totalorder %s1436_s5, %s1157_s29  ;;  %p1161_p9 = scmp.lt.u32.totalorder %s1157_s29, %s1436_s5 }
  0x18   :  { %p1163_p10 = pnand %p1161_p9, %p1158_p8 }
  0x1a   :  { %1166 = shalt.err (!%p1163_p10)
}
  0x1b   :  { %s1167_s2 = scalar_lea.vmem %s63_s24, 1024  ;;  %p1172_p12 = scmp.lt.s32.totalorder %s63_s24, %s63_s24 }
  0x1c   :  { %p1168_p11 = scmp.ne.s32.totalorder %s63_s24, %s1167_s2  ;;  %p1173_p13 = scmp.lt.s32.totalorder %s1167_s2, %s1167_s2 }
  0x1e   :  { %p1174_p0 = por %p1173_p13, %p1172_p12 }
  0x20   :  { %p1175_p1 = pnand %p1174_p0, %p1168_p11 }
  0x22   :  { %1178 = shalt.err (!%p1175_p1)
}
  0x23   :  { %s1256_s10 = smov 64   ;;  %s1257_s14 = smov 4  }
  0x24   :  { %68 = dma.hbm_to_vmem [thread:$0]  %s1436_s5, 1024, %s63_s24, [#allocation8], %s1256_s10, %s1256_s10, %s1257_s14  }
  0x25   :  { %s1179_s21 = scalar_lea.hbm %s1432_s1, 1024 }
  0x26   :  { %p1180_p2 = scmp.ne.s32.totalorder %s1432_s1, %s1179_s21  ;;  %p1183_p3 = scmp.lt.u32.totalorder %s1179_s21, %s1432_s1 }
  0x28   :  { %p1185_p4 = pnand %p1183_p3, %p1180_p2 }
  0x2a   :  { %1188 = shalt.err (!%p1185_p4)
}
  0x2b   :  { %s1189_s28 = scalar_lea.vmem %s25_s26, 1024  ;;  %p1194_p6 = scmp.lt.s32.totalorder %s25_s26, %s25_s26 }
  0x2c   :  { %p1190_p5 = scmp.ne.s32.totalorder %s25_s26, %s1189_s28  ;;  %p1195_p7 = scmp.lt.s32.totalorder %s1189_s28, %s1189_s28 }
  0x2e   :  { %p1196_p8 = por %p1195_p7, %p1194_p6 }
  0x30   :  { %p1197_p9 = pnand %p1196_p8, %p1190_p5 }
  0x32   :  { %1200 = shalt.err (!%p1197_p9)
}
  0x33   :  { %30 = dma.hbm_to_vmem [thread:$0]  %s1432_s1, 1024, %s25_s26, [#allocation3], %s1256_s10, %s1256_s10, %s1257_s14  }
  0x34   :  { %s1258_s29 = smov [#allocation6]   ;;  %s1259_s11 = smov [#allocation9]  }
  0x35   :  { %s50_s30 = sshll.u32 %s1258_s29, 4  ;;  %s74_s12 = sshll.u32 %s1259_s11, 4  ;;  %s51_s30 = int_to_ptr.vmem [resolvable:$true] %s50_s30  ;;  %s75_s12 = int_to_ptr.vmem [resolvable:$true] %s74_s12 }
  0x36   :  { %s1201_s15 = scalar_lea.hbm %s1435_s4, 1024 }
  0x37   :  { %p1202_p10 = scmp.ne.s32.totalorder %s1435_s4, %s1201_s15  ;;  %p1205_p11 = scmp.lt.u32.totalorder %s1201_s15, %s1435_s4 }
  0x39   :  { %p1207_p12 = pnand %p1205_p11, %p1202_p10 }
  0x3b   :  { %1210 = shalt.err (!%p1207_p12)
}
  0x3c   :  { %s1211_s1 = scalar_lea.vmem %s51_s30, 1024  ;;  %p1216_p0 = scmp.lt.s32.totalorder %s51_s30, %s51_s30 }
  0x3d   :  { %p1212_p13 = scmp.ne.s32.totalorder %s51_s30, %s1211_s1  ;;  %p1217_p1 = scmp.lt.s32.totalorder %s1211_s1, %s1211_s1 }
  0x3f   :  { %p1218_p2 = por %p1217_p1, %p1216_p0 }
  0x41   :  { %p1219_p3 = pnand %p1218_p2, %p1212_p13 }
  0x43   :  { %1222 = shalt.err (!%p1219_p3)
}
  0x44   :  { %56 = dma.hbm_to_vmem [thread:$0]  %s1435_s4, 1024, %s51_s30, [#allocation5], %s1252_s19, %s1252_s19, %s1253_s20  }
  0x45   :  { %s1223_s23 = scalar_lea.hbm %s1437_s6, 2048 }
  0x46   :  { %p1224_p4 = scmp.ne.s32.totalorder %s1437_s6, %s1223_s23  ;;  %p1227_p5 = scmp.lt.u32.totalorder %s1223_s23, %s1437_s6 }
  0x48   :  { %p1229_p6 = pnand %p1227_p5, %p1224_p4 }
  0x4a   :  { %1232 = shalt.err (!%p1229_p6)
}
  0x4b   :  { %s1233_s24 = scalar_lea.vmem %s75_s12, 2048  ;;  %p1238_p8 = scmp.lt.s32.totalorder %s75_s12, %s75_s12 }
  0x4c   :  { %p1234_p7 = scmp.ne.s32.totalorder %s75_s12, %s1233_s24  ;;  %p1239_p9 = scmp.lt.s32.totalorder %s1233_s24, %s1233_s24 }
  0x4e   :  { %p1240_p10 = por %p1239_p9, %p1238_p8 }
  0x50   :  { %p1241_p11 = pnand %p1240_p10, %p1234_p7 }
  0x52   :  { %1244 = shalt.err (!%p1241_p11)
}
  0x53   :  { %80 = dma.hbm_to_vmem [thread:$0]  %s1437_s6, 2048, %s75_s12, [#allocation8], %s1252_s19, %s1252_s19, %s1253_s20  }
  0x54   :  { %1245 = dma.done.wait [#allocation3], 1024  }
  0x55   :  { %1246 = vsyncadd [#allocation3], 4294966272 }
  0x56   :  { %1247 = dma.done.wait [#allocation5], 3072  }
  0x57   :  { %1248 = vsyncadd [#allocation5], 4294964224 }
  0x58   :  { %1249 = dma.done.wait [#allocation8], 3072  }
  0x59   :  { %1250 = vsyncadd [#allocation8], 4294964224  ;;  %v1260_v0 = vmov 0   ;;  %vm280_vm0 = vcmask 1043456   ;;  %v101_v1 = vld [vmem:[%s1431_s0] sm:$0xff]  ;;  %vm255_vm1 = vcmask 64512  }
  0x5a   :  { %1109 = vset.pattern.permute.xlu0 %v1260_v0  ;;  %1110 = vset.pattern.permute.xlu1 %v1260_v0  ;;  %v102_v2 = vpack.c.bf16 %v101_v1, %v101_v1  ;;  %v1111_v3 = vld [vmem:[#allocation2] sm:$0xff]   ;;  %v1112_v6 = vld [vmem:[#allocation2 + $0x8] sm:$0xff]   ;;  %v1113_v7 = vld [vmem:[#allocation2 + $0x10] sm:$0xff]   ;;  %vm714_vm2 = vcmask 523264   ;;  %vm1262_vm3 = vmmov 0  }
  0x5b   :  { %v119_v4 = vld [vmem:[#allocation4] sm:$0xff]  ;;  %1012 = vmatprep.mubr.msk.bf16.mxu0 %vm255_vm1, %v1111_v3  ;;  %v120_v8 = vld [vmem:[#allocation4 + $0x8] sm:$0xff]  ;;  %v121_v9 = vld [vmem:[#allocation4 + $0x10] sm:$0xff] }
  0x5c   :  { %1096 = vmatprep.subr.msk.bf16.mxu0 %vm280_vm0, %v102_v2  ;;  %v282_v5 = vsel %vm280_vm0, %v102_v2, 0  ;;  %137 = vperm.xlu0 %1109, %v119_v4   ;;  %v122_v10 = vld [vmem:[#allocation4 + $0x18] sm:$0xff]  ;;  %v123_v11 = vld [vmem:[#allocation4 + $0x20] sm:$0xff]  ;;  %v124_v13 = vld [vmem:[#allocation4 + $0x28] sm:$0xff] }
  0x5d   :  { %1011 = vmatpush3.bf16.msra.mxu0 %v282_v5  ;;  %147 = vperm.xlu1 %1110, %v121_v9   ;;  %v1114_v12 = vld [vmem:[#allocation2 + $0x18] sm:$0xff]   ;;  %v1115_v14 = vld [vmem:[#allocation2 + $0x20] sm:$0xff]   ;;  %v125_v15 = vld [vmem:[#allocation4 + $0x30] sm:$0xff] }
  0x5e   :  { %v126_v16 = vld [vmem:[#allocation4 + $0x38] sm:$0xff]  ;;  %v127_v17 = vld [vmem:[#allocation4 + $0x40] sm:$0xff]  ;;  %v1116_v18 = vld [vmem:[#allocation2 + $0x28] sm:$0xff]  }
  0x5f   :  { %v128_v19 = vld [vmem:[#allocation4 + $0x48] sm:$0xff]  ;;  %v1117_v20 = vld [vmem:[#allocation2 + $0x30] sm:$0xff]   ;;  %v130_v22 = vld [vmem:[#allocation4 + $0x58] sm:$0xff] }
  0x60   :  { %1013 = vmatmul.mubr.msk.bf16.vlgmr.msra.gmra.mrb[0].mxu0 %vm255_vm1, %v1112_v6  ;;  %142 = vperm.xlu0 %1109, %v120_v8   ;;  %v129_v21 = vld [vmem:[#allocation4 + $0x50] sm:$0xff]  ;;  %v131_v23 = vld [vmem:[#allocation4 + $0x60] sm:$0xff]  ;;  %v1118_v24 = vld [vmem:[#allocation2 + $0x38] sm:$0xff]  }
  0x61   :  { %1016 = vmatprep.mubr.msk.bf16.mxu0 %vm255_vm1, %v1113_v7  ;;  %152 = vperm.xlu1 %1110, %v122_v10   ;;  %v132_v25 = vld [vmem:[#allocation4 + $0x68] sm:$0xff]  ;;  %v133_v26 = vld [vmem:[#allocation4 + $0x70] sm:$0xff]  ;;  %v134_v27 = vld [vmem:[#allocation4 + $0x78] sm:$0xff] }
  0x62   :  { %v413_v28 = vld [vmem:[#allocation6] sm:$0xff]  ;;  %v414_v29 = vld [vmem:[#allocation6 + $0x8] sm:$0xff]  ;;  %v415_v30 = vld [vmem:[#allocation6 + $0x10] sm:$0xff] }
  0x63   :  { %v416_v31 = vld [vmem:[#allocation6 + $0x18] sm:$0xff]  ;;  %v417_v32 = vld [vmem:[#allocation6 + $0x20] sm:$0xff]  ;;  %v418_v33 = vld [vmem:[#allocation6 + $0x28] sm:$0xff] }
  0x64   :  { %157 = vperm.xlu0 %1109, %v123_v11   ;;  %v419_v34 = vld [vmem:[#allocation6 + $0x30] sm:$0xff]  ;;  %v420_v35 = vld [vmem:[#allocation6 + $0x38] sm:$0xff]  ;;  %v578_v36 = vld [vmem:[#allocation9] sm:$0xff] }
  0x65   :  { %162 = vperm.xlu1 %1110, %v124_v13   ;;  %v579_v37 = vld [vmem:[#allocation9 + $0x8] sm:$0xff]  ;;  %v580_v38 = vld [vmem:[#allocation9 + $0x10] sm:$0xff]  ;;  %v581_v39 = vld [vmem:[#allocation9 + $0x18] sm:$0xff] }
  0x66   :  { %v582_v40 = vld [vmem:[#allocation9 + $0x20] sm:$0xff]  ;;  %v583_v41 = vld [vmem:[#allocation9 + $0x28] sm:$0xff]  ;;  %v584_v42 = vld [vmem:[#allocation9 + $0x30] sm:$0xff] }
  0x67   :  { %v585_v43 = vld [vmem:[#allocation9 + $0x38] sm:$0xff]  ;;  %v586_v44 = vld [vmem:[#allocation9 + $0x40] sm:$0xff]  ;;  %v587_v45 = vld [vmem:[#allocation9 + $0x48] sm:$0xff] }
  0x68   :  { %1017 = vmatmul.mubr.msk.bf16.gmra.mrb[4].mxu0 %vm255_vm1, %v1114_v12  ;;  %167 = vperm.xlu0 %1109, %v125_v15   ;;  %v588_v46 = vld [vmem:[#allocation9 + $0x50] sm:$0xff]  ;;  %v589_v47 = vld [vmem:[#allocation9 + $0x58] sm:$0xff]  ;;  %v590_v48 = vld [vmem:[#allocation9 + $0x60] sm:$0xff] }
  0x69   :  { %1020 = vmatprep.mubr.msk.bf16.mxu0 %vm255_vm1, %v1115_v14  ;;  %172 = vperm.xlu1 %1110, %v126_v16   ;;  %v591_v49 = vld [vmem:[#allocation9 + $0x68] sm:$0xff]  ;;  %v592_v50 = vld [vmem:[#allocation9 + $0x70] sm:$0xff]  ;;  %v593_v51 = vld [vmem:[#allocation9 + $0x78] sm:$0xff] }
  0x6a   :  { %v861_v52 = vld [vmem:[%s1439_s8] sm:$0xff] }
  0x6b   :  { %v1119_v53 = vld [vmem:[%s1434_s3] sm:$0xff]  }
  0x6c   :  { %177 = vperm.xlu0 %1109, %v127_v17   ;;  %1044 = vmatprep.mubr.bf16.mxu1 %v1119_v53 }
  0x6d   :  { %182 = vperm.xlu1 %1110, %v128_v19  }
  0x70   :  { %1021 = vmatmul.mubr.msk.bf16.gmra.mrb[8].mxu0 %vm255_vm1, %v1116_v18  ;;  %187 = vperm.xlu0 %1109, %v129_v21  }
  0x71   :  { %1024 = vmatprep.mubr.msk.bf16.mxu0 %vm255_vm1, %v1117_v20  ;;  %192 = vperm.xlu1 %1110, %v130_v22  }
  0x74   :  { %197 = vperm.xlu0 %1109, %v131_v23  }
  0x75   :  { %202 = vperm.xlu1 %1110, %v132_v25  }
  0x78   :  { %1025 = vmatmul.mubr.msk.bf16.gmra.mrb[12].mxu0 %vm255_vm1, %v1118_v24  ;;  %207 = vperm.xlu0 %1109, %v133_v26  }
  0x79   :  { %212 = vperm.xlu1 %1110, %v134_v27  }
  0x7c   :  { %423 = vperm.xlu0 %1109, %v413_v28  }
  0x7d   :  { %428 = vperm.xlu1 %1110, %v414_v29  }
  0x80   :  { %433 = vperm.xlu0 %1109, %v415_v30  }
  0x81   :  { %438 = vperm.xlu1 %1110, %v416_v31  }
  0x84   :  { %443 = vperm.xlu0 %1109, %v417_v32  }
  0x85   :  { %448 = vperm.xlu1 %1110, %v418_v33  }
  0x88   :  { %453 = vperm.xlu0 %1109, %v419_v34  }
  0x89   :  { %458 = vperm.xlu1 %1110, %v420_v35  }
  0x8c   :  { %596 = vperm.xlu0 %1109, %v578_v36  }
  0x8d   :  { %601 = vperm.xlu1 %1110, %v579_v37  }
  0x90   :  { %606 = vperm.xlu0 %1109, %v580_v38  }
  0x91   :  { %611 = vperm.xlu1 %1110, %v581_v39  }
  0x94   :  { %616 = vperm.xlu0 %1109, %v582_v40  }
  0x95   :  { %621 = vperm.xlu1 %1110, %v583_v41  }
  0x98   :  { %626 = vperm.xlu0 %1109, %v584_v42  }
  0x99   :  { %631 = vperm.xlu1 %1110, %v585_v43  }
  0x9c   :  { %636 = vperm.xlu0 %1109, %v586_v44  }
  0x9d   :  { %641 = vperm.xlu1 %1110, %v587_v45  }
  0xa0   :  { %646 = vperm.xlu0 %1109, %v588_v46  }
  0xa1   :  { %651 = vperm.xlu1 %1110, %v589_v47  }
  0xa4   :  { %656 = vperm.xlu0 %1109, %v590_v48  }
  0xa5   :  { %661 = vperm.xlu1 %1110, %v591_v49  }
  0xa8   :  { %666 = vperm.xlu0 %1109, %v592_v50  }
  0xa9   :  { %671 = vperm.xlu1 %1110, %v593_v51  }
  0xac   :  { %864 = vperm.xlu0 %1109, %v861_v52  }
  0xdb   :  { %v138_v54 = vpop.permute.xlu0 %137 }
  0xdc   :  { %v148_v55 = vpop.permute.xlu1 %147 }
  0xdf   :  { %v143_v56 = vpop.permute.xlu0 %142 }
  0xe0   :  { %v153_v57 = vpop.permute.xlu1 %152 }
  0xe3   :  { %v158_v58 = vpop.permute.xlu0 %157 }
  0xe4   :  { %v163_v59 = vpop.permute.xlu1 %162 }
  0xe7   :  { %v168_v60 = vpop.permute.xlu0 %167 }
  0xe8   :  { %v173_v0 = vpop.permute.xlu1 %172 }
  0xeb   :  { %v178_v8 = vpop.permute.xlu0 %177 }
  0xec   :  { %v183_v12 = vpop.permute.xlu1 %182 }
  0xef   :  { %v188_v21 = vpop.permute.xlu0 %187 }
  0xf0   :  { %v193_v25 = vpop.permute.xlu1 %192 }
  0xf3   :  { %v198_v33 = vpop.permute.xlu0 %197 }
  0xf4   :  { %v203_v38 = vpop.permute.xlu1 %202 }
  0xf7   :  { %v208_v45 = vpop.permute.xlu0 %207 }
  0xf8   :  { %v213_v50 = vpop.permute.xlu1 %212 }
 0x133   :  { %v1014_v61 = vpop.f32.mrb[0].mxu0 }
 0x134   :  { %v327_v62 = vadd.f32 %v1014_v61, %v148_v55  ;;  %v318_v63 = vpop.f32.mrb[1].mxu0 }
 0x135   :  { %v319_v1 = vadd.f32 %v318_v63, %v138_v54  ;;  %v1015_v2 = vpop.f32.mrb[2].mxu0  ;;  %v1121_v63 = vld [vmem:[%s1434_s3 + $0x10] sm:$0xff]  }
 0x136   :  { %v330_v3 = vadd.f32 %v1015_v2, %v153_v57  ;;  %v321_v4 = vpop.f32.mrb[3].mxu0  ;;  %v383_v6 = vmax.f32 %v327_v62, 0.0  ;;  %v1120_v62 = vld [vmem:[%s1434_s3 + $0x8] sm:$0xff]   ;;  %v424_v2 = vpop.permute.xlu0 %423 }
 0x137   :  { %v322_v5 = vadd.f32 %v321_v4, %v143_v56  ;;  %v381_v9 = vmax.f32 %v319_v1, 0.0  ;;  %v1123_v1 = vld [vmem:[#allocation7] sm:$0xff]  }
 0x138   :  { %v384_v7 = vmax.f32 %v330_v3, 0.0  ;;  %1060 = vmatprep.mubr.msk.bf16.mxu0 %vm714_vm2, %v1123_v1  ;;  %v429_v3 = vpop.permute.xlu1 %428 }
 0x139   :  { %v382_v10 = vmax.f32 %v322_v5, 0.0 }
 0x13a   :  { %v406_v11 = vpack.c.bf16 %v384_v7, %v383_v6  ;;  %v434_v4 = vpop.permute.xlu0 %433 }
 0x13b   :  { %v1018_v13 = vpop.f32.mrb[4].mxu0  ;;  %v405_v14 = vpack.c.bf16 %v382_v10, %v381_v9 }
 0x13c   :  { %v343_v15 = vadd.f32 %v1018_v13, %v168_v60  ;;  %v334_v16 = vpop.f32.mrb[5].mxu0  ;;  %v439_v5 = vpop.permute.xlu1 %438 }
 0x13d   :  { %v335_v17 = vadd.f32 %v334_v16, %v158_v58  ;;  %v1019_v18 = vpop.f32.mrb[6].mxu0  ;;  %1028 = vmatprep.subr.bf16.mxu1 %v405_v14 }
 0x13e   :  { %v346_v19 = vadd.f32 %v1019_v18, %v173_v0  ;;  %v337_v20 = vpop.f32.mrb[7].mxu0  ;;  %1029 = vmatpush3.bf16.msra.mxu1 %v405_v14  ;;  %v387_v23 = vmax.f32 %v343_v15, 0.0  ;;  %v1122_v0 = vld [vmem:[%s1434_s3 + $0x18] sm:$0xff]   ;;  %v444_v9 = vpop.permute.xlu0 %443 }
 0x13f   :  { %v338_v22 = vadd.f32 %v337_v20, %v163_v59  ;;  %1030 = vmatprep.subr.bf16.mxu1 %v406_v11  ;;  %v385_v26 = vmax.f32 %v335_v17, 0.0 }
 0x140   :  { %v388_v24 = vmax.f32 %v346_v19, 0.0  ;;  %v449_v14 = vpop.permute.xlu1 %448 }
 0x141   :  { %v386_v27 = vmax.f32 %v338_v22, 0.0 }
 0x142   :  { %v408_v28 = vpack.c.bf16 %v388_v24, %v387_v23  ;;  %1031 = vmatpush3.bf16.msra.mxu1 %v406_v11 }
 0x143   :  { %v407_v29 = vpack.c.bf16 %v386_v27, %v385_v26  ;;  %v1022_v30 = vpop.f32.mrb[8].mxu0 }
 0x144   :  { %v359_v31 = vadd.f32 %v1022_v30, %v188_v21  ;;  %v350_v32 = vpop.f32.mrb[9].mxu0  ;;  %v454_v21 = vpop.permute.xlu0 %453 }
 0x145   :  { %v351_v34 = vadd.f32 %v350_v32, %v178_v8  ;;  %v1023_v35 = vpop.f32.mrb[10].mxu0  ;;  %1032 = vmatprep.subr.bf16.mxu1 %v407_v29  ;;  %v459_v26 = vpop.permute.xlu1 %458 }
 0x146   :  { %v362_v36 = vadd.f32 %v1023_v35, %v193_v25  ;;  %v353_v37 = vpop.f32.mrb[11].mxu0  ;;  %1033 = vmatpush3.bf16.msra.mxu1 %v407_v29  ;;  %v391_v40 = vmax.f32 %v359_v31, 0.0 }
 0x147   :  { %v354_v39 = vadd.f32 %v353_v37, %v183_v12  ;;  %1034 = vmatprep.subr.bf16.mxu1 %v408_v28  ;;  %v389_v42 = vmax.f32 %v351_v34, 0.0 }
 0x148   :  { %v392_v41 = vmax.f32 %v362_v36, 0.0 }
 0x149   :  { %v390_v43 = vmax.f32 %v354_v39, 0.0  ;;  %v1125_v39 = vld [vmem:[#allocation7 + $0x10] sm:$0xff]  }
 0x14a   :  { %v410_v44 = vpack.c.bf16 %v392_v41, %v391_v40  ;;  %1035 = vmatpush3.bf16.msra.mxu1 %v408_v28  ;;  %v1126_v40 = vld [vmem:[#allocation7 + $0x18] sm:$0xff]   ;;  %v1127_v41 = vld [vmem:[#allocation7 + $0x20] sm:$0xff]  }
 0x14b   :  { %v409_v46 = vpack.c.bf16 %v390_v43, %v389_v42  ;;  %v1026_v47 = vpop.f32.mrb[12].mxu0  ;;  %v1128_v42 = vld [vmem:[#allocation7 + $0x28] sm:$0xff]   ;;  %v1129_v43 = vld [vmem:[#allocation7 + $0x30] sm:$0xff]  }
 0x14c   :  { %v375_v48 = vadd.f32 %v1026_v47, %v208_v45  ;;  %v366_v49 = vpop.f32.mrb[13].mxu0  ;;  %v1261_v45 = vmov 0.0   ;;  %v602_v47 = vpop.permute.xlu1 %601 }
 0x14d   :  { %v367_v51 = vadd.f32 %v366_v49, %v198_v33  ;;  %v1027_v52 = vpop.f32.mrb[14].mxu0  ;;  %1036 = vmatprep.subr.bf16.mxu1 %v409_v46 }
 0x14e   :  { %v378_v53 = vadd.f32 %v1027_v52, %v213_v50  ;;  %v369_v54 = vpop.f32.mrb[15].mxu0  ;;  %1037 = vmatpush3.bf16.msra.mxu1 %v409_v46  ;;  %v395_v56 = vmax.f32 %v375_v48, 0.0  ;;  %v597_v46 = vpop.permute.xlu0 %596 }
 0x14f   :  { %v370_v55 = vadd.f32 %v369_v54, %v203_v38  ;;  %1038 = vmatprep.subr.bf16.mxu1 %v410_v44  ;;  %v393_v58 = vmax.f32 %v367_v51, 0.0  ;;  %v1124_v38 = vld [vmem:[#allocation7 + $0x8] sm:$0xff]  }
 0x150   :  { %v396_v57 = vmax.f32 %v378_v53, 0.0  ;;  %v612_v49 = vpop.permute.xlu1 %611 }
 0x151   :  { %v394_v59 = vmax.f32 %v370_v55, 0.0 }
 0x152   :  { %v412_v60 = vpack.c.bf16 %v396_v57, %v395_v56  ;;  %1039 = vmatpush3.bf16.msra.mxu1 %v410_v44  ;;  %v1130_v44 = vld [vmem:[#allocation7 + $0x38] sm:$0xff]   ;;  %v607_v48 = vpop.permute.xlu0 %606 }
 0x153   :  { %v411_v61 = vpack.c.bf16 %v394_v59, %v393_v58 }
 0x154   :  { %v622_v51 = vpop.permute.xlu1 %621 }
 0x155   :  { %1040 = vmatprep.subr.bf16.mxu1 %v411_v61 }
 0x156   :  { %1041 = vmatpush3.bf16.msra.mxu1 %v411_v61  ;;  %v617_v50 = vpop.permute.xlu0 %616 }
 0x157   :  { %1042 = vmatprep.subr.bf16.mxu1 %v412_v60 }
 0x158   :  { %v632_v56 = vpop.permute.xlu1 %631 }
 0x15a   :  { %1043 = vmatpush3.bf16.msra.mxu1 %v412_v60  ;;  %v627_v52 = vpop.permute.xlu0 %626 }
 0x15b   :  { %1076 = vmatprep.subr.bf16.mxu1 %v1261_v45 }
 0x15d   :  { %1045 = vmatmul.mubr.bf16.vlgmr.msra.gmra.mrb[0].mxu1 %v1120_v62 }
 0x15e   :  { %1048 = vmatprep.mubr.bf16.mxu1 %v1121_v63 }
 0x165   :  { %1049 = vmatmul.mubr.bf16.gmra.mrb[4].mxu1 %v1122_v0  ;;  %v637_v0 = vpop.permute.xlu0 %636 }
 0x166   :  { %1092 = vmatprep.mubr.msk.bf16.mxu1 %vm1262_vm3, %v1261_v45 }
 0x230   :  { %v1046_v6 = vpop.f32.mrb[0].mxu1 }
 0x231   :  { %v528_v7 = vadd.f32 %v1046_v6, %v434_v4  ;;  %v519_v8 = vpop.f32.mrb[1].mxu1  ;;  %v642_v4 = vpop.permute.xlu1 %641 }
 0x232   :  { %v520_v10 = vadd.f32 %v519_v8, %v424_v2  ;;  %v1047_v11 = vpop.f32.mrb[2].mxu1 }
 0x233   :  { %v531_v12 = vadd.f32 %v1047_v11, %v439_v5  ;;  %v522_v13 = vpop.f32.mrb[3].mxu1  ;;  %v552_v16 = vmax.f32 %v528_v7, 0.0 }
 0x234   :  { %v523_v15 = vadd.f32 %v522_v13, %v429_v3  ;;  %v550_v18 = vmax.f32 %v520_v10, 0.0  ;;  %v647_v13 = vpop.permute.xlu0 %646 }
 0x235   :  { %v553_v17 = vmax.f32 %v531_v12, 0.0 }
 0x236   :  { %v551_v19 = vmax.f32 %v523_v15, 0.0 }
 0x237   :  { %v575_v20 = vpack.c.bf16 %v553_v17, %v552_v16  ;;  %v652_v17 = vpop.permute.xlu1 %651 }
 0x238   :  { %v574_v22 = vpack.c.bf16 %v551_v19, %v550_v18  ;;  %v1050_v23 = vpop.f32.mrb[4].mxu1 }
 0x239   :  { %v544_v24 = vadd.f32 %v1050_v23, %v454_v21  ;;  %v535_v25 = vpop.f32.mrb[5].mxu1 }
 0x23a   :  { %v536_v27 = vadd.f32 %v535_v25, %v444_v9  ;;  %v1051_v28 = vpop.f32.mrb[6].mxu1  ;;  %1052 = vmatprep.subr.bf16.mxu0 %v574_v22  ;;  %v657_v25 = vpop.permute.xlu0 %656 }
 0x23b   :  { %v547_v29 = vadd.f32 %v1051_v28, %v459_v26  ;;  %v538_v30 = vpop.f32.mrb[7].mxu1  ;;  %1053 = vmatpush3.bf16.msra.mxu0 %v574_v22  ;;  %v556_v32 = vmax.f32 %v544_v24, 0.0 }
 0x23c   :  { %v539_v31 = vadd.f32 %v538_v30, %v449_v14  ;;  %1054 = vmatprep.subr.bf16.mxu0 %v575_v20  ;;  %v554_v34 = vmax.f32 %v536_v27, 0.0  ;;  %v662_v30 = vpop.permute.xlu1 %661 }
 0x23d   :  { %v557_v33 = vmax.f32 %v547_v29, 0.0 }
 0x23e   :  { %v555_v35 = vmax.f32 %v539_v31, 0.0 }
 0x23f   :  { %v577_v36 = vpack.c.bf16 %v557_v33, %v556_v32  ;;  %1055 = vmatpush3.bf16.msra.mxu0 %v575_v20 }
 0x240   :  { %v576_v37 = vpack.c.bf16 %v555_v35, %v554_v34 }
 0x242   :  { %1056 = vmatprep.subr.bf16.mxu0 %v576_v37 }
 0x243   :  { %1057 = vmatpush3.bf16.msra.mxu0 %v576_v37  ;;  %v667_v37 = vpop.permute.xlu0 %666 }
 0x244   :  { %1058 = vmatprep.subr.bf16.mxu0 %v577_v36 }
 0x247   :  { %1059 = vmatpush3.bf16.msra.mxu0 %v577_v36 }
 0x24a   :  { %1061 = vmatmul.mubr.msk.bf16.vlgmr.msra.gmra.mrb[16].mxu0 %vm714_vm2, %v1124_v38 }
 0x24b   :  { %1064 = vmatprep.mubr.msk.bf16.mxu0 %vm714_vm2, %v1125_v39 }
 0x252   :  { %1065 = vmatmul.mubr.msk.bf16.gmra.mrb[20].mxu0 %vm714_vm2, %v1126_v40 }
 0x253   :  { %1068 = vmatprep.mubr.msk.bf16.mxu0 %vm714_vm2, %v1127_v41 }
 0x25a   :  { %1069 = vmatmul.mubr.msk.bf16.gmra.mrb[24].mxu0 %vm714_vm2, %v1128_v42  ;;  %v672_v42 = vpop.permute.xlu1 %671 }
 0x25b   :  { %1072 = vmatprep.mubr.msk.bf16.mxu0 %vm714_vm2, %v1129_v43 }
 0x262   :  { %1073 = vmatmul.mubr.msk.bf16.gmra.mrb[28].mxu0 %vm714_vm2, %v1130_v44 }
 0x31d   :  { %v1062_v53 = vpop.f32.mrb[16].mxu0 }
 0x31e   :  { %v782_v54 = vadd.f32 %v1062_v53, %v607_v48  ;;  %v773_v55 = vpop.f32.mrb[17].mxu0 }
 0x31f   :  { %v774_v57 = vadd.f32 %v773_v55, %v597_v46  ;;  %v1063_v58 = vpop.f32.mrb[18].mxu0  ;;  %v852_v55 = vld [vmem:[%s1438_s7] sm:$0xf] }
 0x320   :  { %v785_v59 = vadd.f32 %v1063_v58, %v612_v49  ;;  %v776_v60 = vpop.f32.mrb[19].mxu0  ;;  %v838_v62 = vmax.f32 %v782_v54, 0.0 }
 0x321   :  { %v777_v61 = vadd.f32 %v776_v60, %v602_v47  ;;  %v836_v1 = vmax.f32 %v774_v57, 0.0 }
 0x322   :  { %v839_v63 = vmax.f32 %v785_v59, 0.0 }
 0x323   :  { %v837_v2 = vmax.f32 %v777_v61, 0.0 }
 0x324   :  { %v854_v3 = vpack.c.bf16 %v839_v63, %v838_v62 }
 0x325   :  { %v853_v5 = vpack.c.bf16 %v837_v2, %v836_v1  ;;  %v1066_v6 = vpop.f32.mrb[20].mxu0 }
 0x326   :  { %v798_v7 = vadd.f32 %v1066_v6, %v627_v52  ;;  %v789_v8 = vpop.f32.mrb[21].mxu0 }
 0x327   :  { %v790_v9 = vadd.f32 %v789_v8, %v617_v50  ;;  %v1067_v10 = vpop.f32.mrb[22].mxu0  ;;  %1077 = vmatpush3.bf16.msra.mxu1 %v853_v5 }
 0x328   :  { %v801_v11 = vadd.f32 %v1067_v10, %v632_v56  ;;  %v792_v12 = vpop.f32.mrb[23].mxu0  ;;  %1078 = vmatprep.subr.bf16.mxu1 %v1261_v45  ;;  %v842_v15 = vmax.f32 %v798_v7, 0.0  ;;  %v865_v56 = vpop.permute.xlu0 %864 }
 0x329   :  { %v793_v14 = vadd.f32 %v792_v12, %v622_v51  ;;  %v840_v18 = vmax.f32 %v790_v9, 0.0 }
 0x32a   :  { %v843_v16 = vmax.f32 %v801_v11, 0.0 }
 0x32b   :  { %v841_v19 = vmax.f32 %v793_v14, 0.0  ;;  %1079 = vmatpush3.bf16.msra.mxu1 %v854_v3 }
 0x32c   :  { %v856_v20 = vpack.c.bf16 %v843_v16, %v842_v15  ;;  %1080 = vmatprep.subr.bf16.mxu1 %v1261_v45 }
 0x32d   :  { %v855_v21 = vpack.c.bf16 %v841_v19, %v840_v18  ;;  %v1070_v22 = vpop.f32.mrb[24].mxu0 }
 0x32e   :  { %v814_v23 = vadd.f32 %v1070_v22, %v647_v13  ;;  %v805_v24 = vpop.f32.mrb[25].mxu0 }
 0x32f   :  { %v806_v26 = vadd.f32 %v805_v24, %v637_v0  ;;  %v1071_v27 = vpop.f32.mrb[26].mxu0  ;;  %1081 = vmatpush3.bf16.msra.mxu1 %v855_v21 }
 0x330   :  { %v817_v28 = vadd.f32 %v1071_v27, %v652_v17  ;;  %v808_v29 = vpop.f32.mrb[27].mxu0  ;;  %1082 = vmatprep.subr.bf16.mxu1 %v1261_v45  ;;  %v846_v32 = vmax.f32 %v814_v23, 0.0 }
 0x331   :  { %v809_v31 = vadd.f32 %v808_v29, %v642_v4  ;;  %v844_v34 = vmax.f32 %v806_v26, 0.0 }
 0x332   :  { %v847_v33 = vmax.f32 %v817_v28, 0.0 }
 0x333   :  { %v845_v35 = vmax.f32 %v809_v31, 0.0  ;;  %1083 = vmatpush3.bf16.msra.mxu1 %v856_v20 }
 0x334   :  { %v858_v36 = vpack.c.bf16 %v847_v33, %v846_v32  ;;  %1084 = vmatprep.subr.bf16.mxu1 %v1261_v45 }
 0x335   :  { %v857_v38 = vpack.c.bf16 %v845_v35, %v844_v34  ;;  %v1074_v39 = vpop.f32.mrb[28].mxu0 }
 0x336   :  { %v830_v40 = vadd.f32 %v1074_v39, %v667_v37  ;;  %v821_v41 = vpop.f32.mrb[29].mxu0 }
 0x337   :  { %v822_v43 = vadd.f32 %v821_v41, %v657_v25  ;;  %v1075_v44 = vpop.f32.mrb[30].mxu0  ;;  %1085 = vmatpush3.bf16.msra.mxu1 %v857_v38 }
 0x338   :  { %v833_v46 = vadd.f32 %v1075_v44, %v672_v42  ;;  %v824_v47 = vpop.f32.mrb[31].mxu0  ;;  %1086 = vmatprep.subr.bf16.mxu1 %v1261_v45  ;;  %v850_v49 = vmax.f32 %v830_v40, 0.0 }
 0x339   :  { %v825_v48 = vadd.f32 %v824_v47, %v662_v30  ;;  %v848_v51 = vmax.f32 %v822_v43, 0.0 }
 0x33a   :  { %v851_v50 = vmax.f32 %v833_v46, 0.0 }
 0x33b   :  { %v849_v52 = vmax.f32 %v825_v48, 0.0  ;;  %1087 = vmatpush3.bf16.msra.mxu1 %v858_v36 }
 0x33c   :  { %v860_v53 = vpack.c.bf16 %v851_v50, %v850_v49  ;;  %1088 = vmatprep.subr.bf16.mxu1 %v1261_v45 }
 0x33d   :  { %v859_v54 = vpack.c.bf16 %v849_v52, %v848_v51 }
 0x33f   :  { %1089 = vmatpush3.bf16.msra.mxu1 %v859_v54 }
 0x340   :  { %1090 = vmatprep.subr.bf16.mxu1 %v1261_v45 }
 0x343   :  { %1091 = vmatpush3.bf16.msra.mxu1 %v860_v53 }
 0x346   :  { %1093 = vmatmul.mubr.bf16.vlgmr.msra.gmra.mrb[8].mxu1 %v852_v55 }
 0x419   :  { %v901_v57 = vpop.f32.mrb[8].mxu1 }
 0x41a   :  { %v902_v58 = vadd.f32 %v901_v57, %v865_v56  ;;  %v1094_v59 = vpop.f32.mrb[9].mxu1 }
 0x41b   :  { %v904_v60 = vpop.f32.mrb[10].mxu1 }
 0x41c   :  { %v907_v61 = vrot.slane %v902_v58, 4  ;;  %v1095_v62 = vpop.f32.mrb[11].mxu1 }
 0x41e   :  { %v908_v63 = vmax.f32 %v902_v58, %v907_v61 }
 0x420   :  { %v909_v0 = vrot.slane %v908_v63, 2 }
 0x422   :  { %v910_v1 = vmax.f32 %v908_v63, %v909_v0 }
 0x424   :  { %v911_v2 = vrot.slane %v910_v1, 1 }
 0x426   :  { %v912_v3 = vmax.f32 %v910_v1, %v911_v2 }
 0x428   :  { %v913_v4 = vsub.f32 %v902_v58, %v912_v3 }
 0x42a   :  { %v914_v45 = vmul.f32 1.442695, %v913_v4 }
 0x42c   :  { %1131 = vpow2.f32 %v914_v45 }
 0x436   :  { %v1132_v5 = vpop.eup %1131 }
 0x437   :  { %v916_v6 = vrot.slane %v1132_v5, 4 }
 0x439   :  { %v917_v7 = vadd.f32 %v1132_v5, %v916_v6 }
 0x43b   :  { %v918_v8 = vrot.slane %v917_v7, 2 }
 0x43d   :  { %v919_v9 = vadd.f32 %v918_v8, %v917_v7 }
 0x43f   :  { %v920_v10 = vrot.slane %v919_v9, 1 }
 0x441   :  { %v921_v11 = vadd.f32 %v920_v10, %v919_v9 }
 0x443   :  { %1133 = vrcp.f32 %v921_v11 }
 0x44d   :  { %v1134_v12 = vpop.eup %1133 }
 0x44e   :  { %v923_v13 = vmul.f32 %v1134_v12, %v1132_v5 }
 0x450   :  { %924 = vst [vmem:[%s1440_s9] sm:$0xff] %v923_v13 }
 0x451   :  { %929 = vsyncpa [#allocation3], 1 }
 0x452   :  { %930 = vsyncpa [#allocation5], 1 }
 0x453   :  { %931 = vsyncpa [#allocation8], 1 }

</bundles_post_ra>
